<compile_context>
chip_gen: v5e
topology: v5e:2x2
jax: 0.10.0
libtpu: 0.0.40
codegen_flags: <defaults>
</compile_context>

<pallas_src>
import jax
import jax.numpy as jnp
from jax.experimental import pallas as pl
from jax.experimental.pallas import tpu as pltpu


def _lambda_shortcut_kernel(x_ref, sel_ref, o_ref):
    # x_ref:   (TB, C, H*W)       one tile of flattened input images
    # sel_ref: (H*W, Ho*Wo)       combined stride-2 H/W selection matrix (0/1)
    # o_ref:   (TB, C_out, Ho*Wo) lane-dense output tile, C_out = C + 2*pad
    TB, C, HW = x_ref.shape
    _, C_out, HWo = o_ref.shape
    pad = (C_out - C) // 2

    # Single batched matmul: fold (TB, C) into M so the MXU sees one dot
    # instead of TB*C tiny ones.  Selection entries are exact 0/1 with a
    # single nonzero per column, so the f32-accumulated result is bit-exact.
    xm = x_ref[...].reshape(TB * C, HW)
    t = jnp.dot(xm, sel_ref[...], preferred_element_type=jnp.float32)
    t = t.reshape(TB, C, HWo).astype(o_ref.dtype)

    # Zero only the padded channels; write the computed middle channels once.
    if pad > 0:
        z = jnp.zeros((TB, pad, HWo), o_ref.dtype)
        o_ref[:, :pad, :] = z
        o_ref[:, pad + C:, :] = z
    o_ref[:, pad:pad + C, :] = t


def lambda_layer(x, planes):
    """Pallas equivalent of LambdaLayer with the ResNet option-A shortcut lambda.

    Computes pad(x[:, :, ::2, ::2], channel pad = planes // 4 on each side).
    """
    B, C, H, W = x.shape
    pad = planes // 4
    C_out = C + 2 * pad
    Ho, Wo = (H + 1) // 2, (W + 1) // 2          # matches PyTorch ::2 (ceil)
    HW, HWo = H * W, Ho * Wo

    # Combined stride-2 selection over flattened spatial dims:
    #   out[.., ho*Wo + wo] = x[.., (2*ho)*W + 2*wo]
    k_idx = jnp.arange(HW, dtype=jnp.int32)[:, None]
    n_idx = jnp.arange(HWo, dtype=jnp.int32)[None, :]
    src = 2 * (n_idx // Wo) * W + 2 * (n_idx % Wo)
    sel = (k_idx == src).astype(x.dtype)          # (HW, HWo)

    x_flat = x.reshape(B, C, HW)                  # free row-major reshape

    # Batch tile: as many images per grid step as fit an ~8 MiB block budget
    # (double-buffered in+out), but keep >= 2 grid steps when B >= 2 so the
    # "parallel" batch axis shards across v7x's 2 TensorCores.
    itemsize = x.dtype.itemsize
    per_img = 2 * (C * HW + C_out * HWo) * itemsize
    tb = max(1, (8 * 1024 * 1024) // max(per_img, 1))
    tb = min(tb, max(1, B // 2))
    while B % tb:
        tb -= 1
    grid = (B // tb,)

    bytes_accessed = (B * C * HW + B * C_out * HWo + HW * HWo) * itemsize
    flops = 2 * B * C * HW * HWo                  # selection matmul MACs * 2

    out_flat = pl.pallas_call(
        _lambda_shortcut_kernel,
        out_shape=jax.ShapeDtypeStruct((B, C_out, HWo), x.dtype),
        grid=grid,
        in_specs=[
            pl.BlockSpec((tb, C, HW), lambda b: (b, 0, 0)),
            pl.BlockSpec((HW, HWo), lambda b: (0, 0)),   # constant -> resident
        ],
        out_specs=pl.BlockSpec((tb, C_out, HWo), lambda b: (b, 0, 0)),
        compiler_params=pltpu.CompilerParams(
            dimension_semantics=("parallel",),
            vmem_limit_bytes=32 * 1024 * 1024,
        ),
        cost_estimate=pl.CostEstimate(
            flops=int(flops), transcendentals=0,
            bytes_accessed=int(bytes_accessed)),
    )(x_flat, sel)

    return out_flat.reshape(B, C_out, Ho, Wo)


if __name__ == "__main__":
    key = jax.random.PRNGKey(0)

    def ref_lambda(x, planes):
        # F.pad(x[:, :, ::2, ::2], (0,0,0,0, planes//4, planes//4), "constant", 0)
        p = planes // 4
        return jnp.pad(x[:, :, ::2, ::2], ((0, 0), (p, p), (0, 0), (0, 0)))

    cases = [
        ((2, 4, 16, 16), 8),      # small demo shape
        ((2, 16, 32, 32), 32),    # canonical CIFAR ResNet option-A shortcut
        ((2, 4, 7, 9), 8),        # odd spatial dims (ceil behaviour of ::2)
    ]
    for shape, planes in cases:
        key, sub = jax.random.split(key)
        x = jax.random.normal(sub, shape, dtype=jnp.float32)
        out = lambda_layer(x, planes)
        jax.block_until_ready(out)
        ref = ref_lambda(x, planes)
        assert out.shape == ref.shape, (out.shape, ref.shape)
        assert jnp.allclose(out, ref, atol=1e-6), f"mismatch for {shape}"

    print("KERNEL_OK")
</pallas_src>

<mosaic_0001>
module attributes {stable_mosaic.version = 11 : i64} {
  func.func @_lambda_shortcut_kernel(%arg0: i32, %arg1: memref<1x4x256xf32, #tpu.memory_space<vmem>>, %arg2: memref<256x64xf32, #tpu.memory_space<vmem>>, %arg3: memref<1x8x64xf32, #tpu.memory_space<vmem>>) attributes {dimension_semantics = [#tpu.dimension_semantics<parallel>], iteration_bounds = array<i64: 2>, scalar_prefetch = 0 : i64, scratch_operands = 0 : i64, tpu.core_type = #tpu.core_type<tc>, window_params = [{transform_indices = @transform_0, window_bounds = array<i64: 1, 4, 256>}, {pipeline_mode = #tpu.pipeline_mode<synchronous>, transform_indices = @transform_1, window_bounds = array<i64: 256, 64>}, {transform_indices = @transform_2, window_bounds = array<i64: 1, 8, 64>}]} {
    %c0 = arith.constant 0 : index
    %c0_0 = arith.constant 0 : index
    %c0_1 = arith.constant 0 : index
    %0 = vector.load %arg1[%c0, %c0_0, %c0_1] : memref<1x4x256xf32, #tpu.memory_space<vmem>>, vector<1x4x256xf32>
    %1 = vector.shape_cast %0 : vector<1x4x256xf32> to vector<4x256xf32>
    %c0_2 = arith.constant 0 : index
    %c0_3 = arith.constant 0 : index
    %2 = vector.load %arg2[%c0_2, %c0_3] : memref<256x64xf32, #tpu.memory_space<vmem>>, vector<256x64xf32>
    %cst = arith.constant dense<0.000000e+00> : vector<4x64xf32>
    %3 = tpu.matmul %1, %2, %cst {dimension_numbers = #tpu.dot_dimension_numbers<[1], [0], [0], [1], [0, 0, 1, 1], [], []>} : vector<4x256xf32>, vector<256x64xf32>, vector<4x64xf32> -> vector<4x64xf32>
    %4 = vector.shape_cast %3 : vector<4x64xf32> to vector<1x4x64xf32>
    %cst_4 = arith.constant 0.000000e+00 : f32
    %5 = vector.broadcast %cst_4 : f32 to vector<1x2x64xf32>
    %c0_5 = arith.constant 0 : index
    %c0_6 = arith.constant 0 : index
    %c0_7 = arith.constant 0 : index
    %6 = vector.load %arg3[%c0_5, %c0_6, %c0_7] : memref<1x8x64xf32, #tpu.memory_space<vmem>>, vector<1x2x64xf32>
    tpu.vector_store %arg3[%c0_5, %c0_6, %c0_7], %5 {strides = array<i32>} : memref<1x8x64xf32, #tpu.memory_space<vmem>>, vector<1x2x64xf32>,
    %c0_8 = arith.constant 0 : index
    %c6 = arith.constant 6 : index
    %c0_9 = arith.constant 0 : index
    %7 = vector.load %arg3[%c0_8, %c6, %c0_9] : memref<1x8x64xf32, #tpu.memory_space<vmem>>, vector<1x2x64xf32>
    tpu.vector_store %arg3[%c0_8, %c6, %c0_9], %5 {strides = array<i32>} : memref<1x8x64xf32, #tpu.memory_space<vmem>>, vector<1x2x64xf32>,
    %c0_10 = arith.constant 0 : index
    %c2 = arith.constant 2 : index
    %c0_11 = arith.constant 0 : index
    %8 = vector.load %arg3[%c0_10, %c2, %c0_11] : memref<1x8x64xf32, #tpu.memory_space<vmem>>, vector<1x4x64xf32>
    tpu.vector_store %arg3[%c0_10, %c2, %c0_11], %4 {strides = array<i32>} : memref<1x8x64xf32, #tpu.memory_space<vmem>>, vector<1x4x64xf32>,
    return
  }
  func.func @transform_0(%arg0: i32) -> (i32, i32, i32) {
    %c0_i32 = arith.constant 0 : i32
    %c0_i32_0 = arith.constant 0 : i32
    %c0_i32_1 = arith.constant 0 : i32
    return %arg0, %c0_i32, %c0_i32_0 : i32, i32, i32
  }
  func.func @transform_1(%arg0: i32) -> (i32, i32) {
    %c0_i32 = arith.constant 0 : i32
    %c0_i32_0 = arith.constant 0 : i32
    %c0_i32_1 = arith.constant 0 : i32
    return %c0_i32, %c0_i32_0 : i32, i32
  }
  func.func @transform_2(%arg0: i32) -> (i32, i32, i32) {
    %c0_i32 = arith.constant 0 : i32
    %c0_i32_0 = arith.constant 0 : i32
    %c0_i32_1 = arith.constant 0 : i32
    return %arg0, %c0_i32, %c0_i32_0 : i32, i32, i32
  }
}

</mosaic_0001>

<bundles_post_ra>
// kernel: tpu_custom_call.1
= control target key start
LH: loop header
LB: loop body
LE: loop exit
PB: predicated region body
PF: predicated region fallthrough
CT: control target
= control target key end

     0   :  { %7 = vsyncpa [#allocation3], 0  ;;  %s614_s0 = inlined_call_operand.vmem [shape: f32[2,4,256], index: 0, kind: input, shape index: {}]   ;;  %s615_s1 = inlined_call_operand.vmem [shape: f32[256,64], index: 1, kind: input, shape index: {}]   ;;  %s616_s2 = inlined_call_operand.hbm [shape: f32[2,8,64], index: 2, kind: output, shape index: {}]  }
   0x1   :  { %9 = vsyncpa [#allocation3 + $0x1], 0  ;;  %s433_s9 = smov 0   ;;  %s435_s10 = smov 0  }
   0x2   :  { %s437_s11 = smov 0   ;;  %s439_s12 = smov 0  }
   0x3 LB: > { %s454_s13 = sadd.s32 4294967295, %s415_s12   ;;  %s301_s14 = sadd.s32 4294967294, %s415_s12   ;;  %s415_s12 = sphi %s439_s12, %s622_s12   ;;  %s411_s11 = sphi %s437_s11, %s621_s11   ;;  %s407_s10 = sphi %s435_s10, %s620_s10   ;;  %s403_s9 = sphi %s433_s9, %s619_s9  }
   0x4   : > { %s458_s15 = sadd.s32 1, %s415_s12   ;;  %s69_s16 = sadd.s32 1, %s411_s11 }
   0x5   : > { %s66_s17 = ssub.s32 %s415_s12, %s458_s15  ;;  %p79_p0 = scmp.ne.s32.totalorder %s411_s11, %s407_s10 }
   0x6   : > { %p67_p1 = scmp.eq.s32.totalorder %s66_s17, 0  ;;  %p80_p2 = scmp.eq.s32.totalorder %s454_s13, 1 }
   0x7   : > { %p85_p3 = scmp.ne.s32.totalorder %s407_s10, %s403_s9  ;;  %p86_p4 = scmp.eq.s32.totalorder %s301_s14, 1 }
   0x8   : > { %s469_s18 = scalar_select %p67_p1, %s411_s11, %s69_s16  }
   0x9   : > { %p471_p5 = por %p80_p2, %p79_p0  ;;  %p475_p6 = por %p86_p4, %p85_p3 }
   0xa   : > { %p304_p7 = scmp.ge.s32.totalorder %s415_s12, 1  ;;  %p115_p8 = scmp.lt.s32.totalorder %s415_s12, 3 }
   0xc   : > { %p116_p9 = pnand %p304_p7, %p115_p8 }
   0xd   : > { %p137_p10 = scmp.lt.s32.totalorder (!%p116_p9), %s454_s13, 1  ;;  %s309_s8 = sshll.u32 (!%p116_p9), %s454_s13, 3 }
   0xe   : > { %119 = sbr.rel (%p116_p9) target bundleno = 183 (0xb7), region = 28  ;;  %s237_s17 = scalar_lea.hbm (!%p116_p9), %s616_s2, %s309_s8 }
   0xf   : > { %s241_s22 = sshll.u32 (!%p116_p9), %s237_s17, 4  ;;  %s373_s27 = scalar_lea.hbm (!%p116_p9), %s616_s2, 16  ;;  %s242_s22 = int_to_ptr.hbm [resolvable:$true] %s241_s22 }
  0x10   : > { %s367_s24 = sshra.s32 (!%p116_p9), %s242_s22, 4  ;;  %s368_s24 = int_to_ptr.hbm [resolvable:$true] %s367_s24 }
  0x11   : > { %s369_s25 = scalar_lea.hbm (!%p116_p9), %s368_s24, 8  ;;  %p374_p0 = scmp.lt.s32.totalorder (!%p116_p9), %s368_s24, %s616_s2 }
  0x12   : > { %p370_p11 = scmp.ne.s32.totalorder (!%p116_p9), %s368_s24, %s369_s25  ;;  %p375_p1 = scmp.lt.s32.totalorder (!%p116_p9), %s373_s27, %s369_s25 }
  0x13   : > { %v158_v0 = vld [vmem:[%s615_s1 + $0x78] sm:$0xff]  ;;  %v157_v2 = vld [vmem:[%s615_s1 + $0x70] sm:$0xff]  ;;  %v156_v4 = vld [vmem:[%s615_s1 + $0x68] sm:$0xff]  ;;  %s138_s5 = scalar_select %p137_p10, %s454_s13, 1  ;;  %vm221_vm0 = vcmask 517120   ;;  %v417_v35 = vmov 0.0  }
  0x14   : > { %v174_v1 = vld [vmem:[%s615_s1 + $0xf8] sm:$0xff]  ;;  %181 = vmatpush.msra.mxu0 %v158_v0  ;;  %v173_v3 = vld [vmem:[%s615_s1 + $0xf0] sm:$0xff]  ;;  %v172_v5 = vld [vmem:[%s615_s1 + $0xe8] sm:$0xff]  ;;  %vm224_vm1 = vcmask 519168   ;;  %p371_p12 = pnand %p370_p11, %p471_p5  ;;  %p376_p2 = por %p375_p1, %p374_p0 }
  0x15   : > { %201 = vmatpush.msra.mxu1 %v174_v1  ;;  %v155_v6 = vld [vmem:[%s615_s1 + $0x60] sm:$0xff]  ;;  %s312_s16 = sshll.u32 %s138_s5, 3  ;;  %v154_v8 = vld [vmem:[%s615_s1 + $0x58] sm:$0xff]  ;;  %v153_v10 = vld [vmem:[%s615_s1 + $0x50] sm:$0xff]  ;;  %s134_s5 = sand.u32 1, %s407_s10  }
  0x16   : > { %182 = vmatpush.msra.mxu0 %v157_v2  ;;  %v171_v7 = vld [vmem:[%s615_s1 + $0xe0] sm:$0xff]  ;;  %v170_v9 = vld [vmem:[%s615_s1 + $0xd8] sm:$0xff]  ;;  %s141_s26 = scalar_lea.vmem %s614_s0, %s312_s16  ;;  %v169_v11 = vld [vmem:[%s615_s1 + $0xd0] sm:$0xff]  ;;  %s305_s6 = sshll.u32 %s134_s5, 3 }
  0x17   : > { %202 = vmatpush.msra.mxu1 %v173_v3  ;;  %v152_v12 = vld [vmem:[%s615_s1 + $0x48] sm:$0xff]  ;;  %v142_v14 = vld [vmem:[%s141_s26] sm:$0xff]  ;;  %v150_v17 = vld [vmem:[%s615_s1 + $0x38] sm:$0xff]  ;;  %s136_s7 = scalar_lea.vmem [#allocation2], %s305_s6  ;;  %s227_s23 = scalar_lea.sflag [#allocation3], %s134_s5 }
  0x18   : > { %183 = vmatpush.msra.mxu0 %v156_v4  ;;  %v168_v13 = vld [vmem:[%s615_s1 + $0xc8] sm:$0xff]  ;;  %176 = vst [vmem:[#allocation1] ss:$2 sm:$0xff] %v142_v14  ;;  %v151_v15 = vld [vmem:[%s615_s1 + $0x40] sm:$0xff]  ;;  %v166_v18 = vld [vmem:[%s615_s1 + $0xb8] sm:$0xff]  ;;  %s239_s21 = sshll.u32 %s136_s7, 4  ;;  %p372_p13 = pneg %p371_p12  ;;  %s240_s21 = int_to_ptr.vmem [resolvable:$true] %s239_s21 }
  0x19   : > { %203 = vmatpush.msra.mxu1 %v172_v5  ;;  %v167_v16 = vld [vmem:[%s615_s1 + $0xc0] sm:$0xff]  ;;  %v149_v19 = vld [vmem:[%s615_s1 + $0x30] sm:$0xff]  ;;  %v148_v21 = vld [vmem:[%s615_s1 + $0x28] sm:$0xff]  ;;  %222 = vst.msk [vmem:[%s136_s7] sm:$0x3] %vm221_vm0, %v417_v35 }
  0x1a   : > { %184 = vmatpush.msra.mxu0 %v155_v6  ;;  %v165_v20 = vld [vmem:[%s615_s1 + $0xb0] sm:$0xff]  ;;  %v164_v22 = vld [vmem:[%s615_s1 + $0xa8] sm:$0xff]  ;;  %v147_v23 = vld [vmem:[%s615_s1 + $0x20] sm:$0xff]  ;;  %223 = vst.msk [vmem:[%s136_s7 + $0x6] sm:$0x3] %vm221_vm0, %v417_v35  ;;  %p377_p3 = pnand %p376_p2, %p372_p13 }
  0x1b   : > { %204 = vmatpush.msra.mxu1 %v171_v7  ;;  %v163_v24 = vld [vmem:[%s615_s1 + $0xa0] sm:$0xff]  ;;  %v146_v25 = vld [vmem:[%s615_s1 + $0x18] sm:$0xff]  ;;  %v145_v27 = vld [vmem:[%s615_s1 + $0x10] sm:$0xff] }
  0x1c   : > { %185 = vmatpush.msra.mxu0 %v154_v8  ;;  %v162_v26 = vld [vmem:[%s615_s1 + $0x98] sm:$0xff]  ;;  %v161_v28 = vld [vmem:[%s615_s1 + $0x90] sm:$0xff]  ;;  %v144_v29 = vld [vmem:[%s615_s1 + $0x8] sm:$0xff] }
  0x1d   : > { %205 = vmatpush.msra.mxu1 %v170_v9  ;;  %v160_v30 = vld [vmem:[%s615_s1 + $0x88] sm:$0xff]  ;;  %v143_v31 = vld [vmem:[%s615_s1] sm:$0xff] }
  0x1e   : > { %186 = vmatpush.msra.mxu0 %v153_v10  ;;  %v159_v32 = vld [vmem:[%s615_s1 + $0x80] sm:$0xff] }
  0x1f   : > { %206 = vmatpush.msra.mxu1 %v169_v11  ;;  %v177_v33 = vld.sshfl [vmem:[#allocation1] sm:$0xff pattern:$0x75316420]  ;;  %v178_v34 = vld.sshfl [vmem:[#allocation1 + $0x8] sm:$0xff pattern:$0x75316420] }
  0x20   : > { %187 = vmatpush.msra.mxu0 %v152_v12 }
  0x21   : > { %207 = vmatpush.msra.mxu1 %v168_v13 }
  0x22   : > { %188 = vmatpush.msra.mxu0 %v151_v15 }
  0x23   : > { %208 = vmatpush.msra.mxu1 %v167_v16 }
  0x24   : > { %189 = vmatpush.msra.mxu0 %v150_v17 }
  0x25   : > { %209 = vmatpush.msra.mxu1 %v166_v18 }
  0x26   : > { %190 = vmatpush.msra.mxu0 %v149_v19 }
  0x27   : > { %210 = vmatpush.msra.mxu1 %v165_v20 }
  0x28   : > { %191 = vmatpush.msra.mxu0 %v148_v21 }
  0x29   : > { %211 = vmatpush.msra.mxu1 %v164_v22 }
  0x2a   : > { %192 = vmatpush.msra.mxu0 %v147_v23 }
  0x2b   : > { %212 = vmatpush.msra.mxu1 %v163_v24 }
  0x2c   : > { %193 = vmatpush.msra.mxu0 %v146_v25 }
  0x2d   : > { %213 = vmatpush.msra.mxu1 %v162_v26 }
  0x2e   : > { %194 = vmatpush.msra.mxu0 %v145_v27 }
  0x2f   : > { %214 = vmatpush.msra.mxu1 %v161_v28 }
  0x30   : > { %195 = vmatpush.msra.mxu0 %v144_v29 }
  0x31   : > { %215 = vmatpush.msra.mxu1 %v160_v30 }
  0x32   : > { %196 = vmatpush.msra.mxu0 %v143_v31 }
  0x33   : > { %216 = vmatpush.msra.mxu1 %v159_v32  ;;  %197 = vmatmul.f32.vlgmr.msra.gmra.mxu0 %v177_v33 }
  0x34   : > { %217 = vmatmul.f32.vlgmr.msra.gmra.mxu1 %v178_v34 }
  0xb0   : > { %v198_v36 = vpop.f32.mrf.mxu0 }
  0xb1   : > { %v218_v37 = vpop.f32.mrf.mxu1 }
  0xb2   : > { %v219_v38 = vadd.f32 %v218_v37, %v198_v36 }
  0xb4   : > { %225 = vst.msk [vmem:[%s136_s7 + $0x2] sm:$0xf] %vm224_vm1, %v219_v38 }
  0xb5   : > { %380 = shalt.err (!%p377_p3)
}
  0xb6   : > { %313 = dma.vmem_to_hbm [thread:$0]  (%p471_p5), %s240_s21, 128, %s242_s22, %s227_s23  }
  0xb7 PF: > { %p319_p4 = scmp.ge.s32.totalorder %s415_s12, 2  ;;  %s253_s30 = sand.u32 1, %s403_s9  }
  0xb8   : > { %s254_s3 = scalar_lea.sflag [#allocation3], %s253_s30 }
  0xb9   : > { %p316_p7 = pnand %p319_p4, %p475_p6 }
  0xbb   : > { %p317_p8 = pneg %p316_p7 }
  0xbd   : > { %398 = dma.done.wait (%p317_p8), %s254_s3, 128  }
  0xbe   : > { %400 = vsyncadd (%p317_p8), %s254_s3, 4294967168  ;;  %p12_p9 = scmp.ge.s32.totalorder %s458_s15, 4   ;;  %s619_s9 = smov %s407_s10 }
  0xbf   : > { %s620_s10 = smov %s411_s11  ;;  %s621_s11 = smov %s469_s18 }
  0xc0   : > { %s622_s12 = smov %s458_s15  ;;  %14 = sbr.rel (!%p12_p9) target bundleno = 3 (0x3), region = 63 }
  0xc5   :  { %260 = vsyncpa [#allocation3], 1 }
  0xc6   :  { %262 = vsyncpa [#allocation3 + $0x1], 1 }

</bundles_post_ra>
